<compile_context>
chip_gen: v7x
topology: tpu7x:2x2x1
jax: 0.10.0
libtpu: 0.0.40
codegen_flags: <defaults>
</compile_context>

<pallas_src>
import functools

import jax
import jax.numpy as jnp
from jax import lax
from jax.experimental import pallas as pl
from jax.experimental.pallas import tpu as pltpu

VOCAB_CLIP = 32100  # hard-coded slice bound from the PyTorch module


def _round_up(x, m):
    return ((x + m - 1) // m) * m


def _vmem_budget_bytes():
    """Generation-aware scoped-VMEM limit (~3/4 of physical capacity).

    v5e/v6e: 128 MiB physical -> 96 MiB budget; v7x: 64 MiB -> 48 MiB.
    Falls back to a conservative 48 MiB if the query is unavailable.
    """
    cap = 64 << 20
    try:
        cap = int(pltpu.get_tpu_info().vmem_capacity_bytes)
    except Exception:
        pass
    return (cap * 3) // 4


# ---------------------------------------------------------------------------
# Path 1a: integer ids, table fits in VMEM -> resident-table vectorized gather
# ---------------------------------------------------------------------------
def _gather_resident_kernel(ids_ref, w_hbm, o_ref, w_vmem, *, rows_per_block):
    # ids_ref: SMEM (n_pad,) int32 scalar-prefetch ids
    # w_hbm:   HBM (V, D) embedding table (memory_space=pl.ANY)
    # o_ref:   VMEM (rows_per_block, D) output tile
    # w_vmem:  VMEM (V, D) scratch -- table copied in exactly once (1x, not 2x)

    # One-shot table load, keyed on program_id == 0. This requires the grid
    # axis to be "arbitrary" (sequential on one core); large tables -- the case
    # where v7x megacore sharding would matter -- use the DMA path instead.
    @pl.when(pl.program_id(0) == 0)
    def _():
        pltpu.sync_copy(w_hbm, w_vmem)

    base = pl.program_id(0) * rows_per_block
    vocab = w_vmem.shape[0]

    def group(m, carry):
        start = pl.multiple_of(m * 8, 8)
        # Gather 8 rows (dynamic-sublane loads) and store one (8, D) aligned
        # slab: full-vreg stores, ~8x less store-slot traffic than per-row.
        rows = [
            w_vmem[pl.ds(jnp.clip(ids_ref[base + start + r], 0, vocab - 1), 1), :]
            for r in range(8)
        ]
        o_ref[pl.ds(start, 8), :] = jnp.concatenate(rows, axis=0)
        return carry

    lax.fori_loop(0, rows_per_block // 8, group, 0, unroll=2)


# ---------------------------------------------------------------------------
# Path 1b: integer ids, table too large for VMEM -> DMA-engine gather from HBM
# ---------------------------------------------------------------------------
def _gather_dma_kernel(ids_ref, w_hbm, o_ref, sems, *, rows_per_block, window):
    # Per-row DMA from the HBM table directly into the output block, with
    # `window` copies in flight on a semaphore ring.
    base = pl.program_id(0) * rows_per_block
    vocab = w_hbm.shape[0]

    def row_copy(j):
        idx = jnp.clip(ids_ref[base + j], 0, vocab - 1)
        return pltpu.make_async_copy(
            w_hbm.at[pl.ds(idx, 1), :],
            o_ref.at[pl.ds(j, 1), :],
            sems.at[j % window])

    @pl.loop(0, window)
    def _prime(j):
        row_copy(j).start()

    @pl.loop(0, rows_per_block)
    def _drain(j):
        row_copy(j).wait()

        @pl.when(j + window < rows_per_block)
        def _():
            row_copy(j + window).start()


def embedding_lookup(ids, weight, *, rows_per_block=512, gather_mode="auto",
                     dma_window=8):
    """ids: (B, S) int, weight: (V, D) -> (B, S, D). OOB ids are clamped."""
    B, S = ids.shape
    V, D = weight.shape
    n = B * S

    g = max(8, min(_round_up(rows_per_block, 8), _round_up(n, 8)))
    n_pad = _round_up(n, g)

    flat_ids = ids.reshape(-1).astype(jnp.int32)
    if n_pad != n:
        flat_ids = jnp.pad(flat_ids, (0, n_pad - n))  # pad rows gather row 0, sliced off

    budget = _vmem_budget_bytes()
    itemsize = weight.dtype.itemsize
    # 1x resident table + double-buffered (g, D) output block + margin.
    resident_fits = V * D * itemsize + 2 * g * D * itemsize + (4 << 20) <= budget
    if gather_mode == "auto":
        gather_mode = "resident" if resident_fits else "dma"

    if gather_mode == "resident":
        kernel = functools.partial(_gather_resident_kernel, rows_per_block=g)
        scratch = [pltpu.VMEM((V, D), weight.dtype)]
        # Sequential grid: the one-shot table load is keyed on program_id == 0.
        semantics = ("arbitrary",)
    else:
        window = max(1, min(dma_window, g))
        kernel = functools.partial(_gather_dma_kernel, rows_per_block=g,
                                   window=window)
        scratch = [pltpu.SemaphoreType.DMA((window,))]
        semantics = ("parallel",)  # stateless per block -> megacore-friendly

    out_flat = pl.pallas_call(
        kernel,
        out_shape=jax.ShapeDtypeStruct((n_pad, D), weight.dtype),
        grid_spec=pltpu.PrefetchScalarGridSpec(
            num_scalar_prefetch=1,
            grid=(n_pad // g,),
            in_specs=[pl.BlockSpec(memory_space=pl.ANY)],   # weight stays in HBM
            out_specs=pl.BlockSpec((g, D), lambda i, ids_s: (i, 0)),
            scratch_shapes=scratch),
        compiler_params=pltpu.CompilerParams(
            dimension_semantics=semantics,
            vmem_limit_bytes=budget),
    )(flat_ids, weight)

    if n_pad != n:
        out_flat = out_flat[:n]
    return out_flat.reshape(B, S, D)


# ---------------------------------------------------------------------------
# Path 2: float "soft" mask -> tiled MXU matmul with the (clipped) table
# ---------------------------------------------------------------------------
def _matmul_kernel(x_ref, w_ref, o_ref, *, vc, tk, need_mask, use_bf16):
    k = pl.program_id(2)

    @pl.when(k == 0)
    def _():
        o_ref[...] = jnp.zeros_like(o_ref)   # f32 output block is the accumulator

    def accum(mask_tail):
        x = x_ref[...]
        w = w_ref[...]
        if mask_tail:
            # Zero x columns / w rows whose global K index is >= vc (the 32100
            # clip and the ragged edge of the last tile). Masking BOTH operands
            # keeps 0 * garbage (from padded edge blocks) from producing NaN.
            col = k * tk + lax.broadcasted_iota(jnp.int32, (1, tk), 1)
            x = jnp.where(col < vc, x, jnp.zeros_like(x))
            row = k * tk + lax.broadcasted_iota(jnp.int32, (tk, 1), 0)
            w = jnp.where(row < vc, w, jnp.zeros_like(w))
        if use_bf16:
            x = x.astype(jnp.bfloat16)
            w = w.astype(jnp.bfloat16)
        o_ref[...] += jnp.dot(x, w, preferred_element_type=jnp.float32)

    if need_mask:
        last = pl.num_programs(2) - 1

        @pl.when(k == last)        # only the last K tile pays the iota/select cost
        def _():
            accum(True)

        @pl.when(k < last)
        def _():
            accum(False)
    else:
        accum(False)


def _pick_tn(D, Mt):
    if D % 128 != 0:
        return D            # ragged feature dim: one full-width (lane-masked) tile
    if Mt == 1 and D >= 256:
        # Decode-style shapes (tiny M): split D so both v7x TensorCores get work.
        return 128 if D <= 256 else 256
    if D <= 512:
        return D
    for c in (512, 256, 128):
        if D % c == 0:
            return c
    return D


def soft_embedding_matmul(mask, weight, *, tm=512, tk=1024, use_bf16=False):
    """mask: (B, S, V) float, weight: (Vw, D) -> (B, S, D) f32
       == mask[:, :, :32100] @ weight[:32100, :]."""
    B, S, V = mask.shape
    Vw, D = weight.shape
    Vc = min(V, Vw, VOCAB_CLIP)
    M = B * S

    x = mask.reshape(M, V)                 # no-copy leading-dim collapse

    tm = min(tm, _round_up(M, 8))
    tk = min(tk, _round_up(Vc, 128))
    Mt = pl.cdiv(M, tm)
    Kt = pl.cdiv(Vc, tk)
    tn = _pick_tn(D, Mt)
    Nt = pl.cdiv(D, tn)
    need_mask = (Vc % tk) != 0             # only the last K tile crosses the clip

    kernel = functools.partial(_matmul_kernel, vc=Vc, tk=tk,
                               need_mask=need_mask, use_bf16=use_bf16)
    out_flat = pl.pallas_call(
        kernel,
        out_shape=jax.ShapeDtypeStruct((M, D), jnp.float32),
        grid_spec=pltpu.PrefetchScalarGridSpec(
            num_scalar_prefetch=0,
            grid=(Mt, Nt, Kt),
            in_specs=[pl.BlockSpec((tm, tk), lambda i, j, k: (i, k)),
                      # TODO(synk): pipeline_mode=pl.Buffered(3) on this weight
                      # stream if a v6e profile shows exposed DMA.
                      pl.BlockSpec((tk, tn), lambda i, j, k: (k, j))],
            out_specs=pl.BlockSpec((tm, tn), lambda i, j, k: (i, j))),
        compiler_params=pltpu.CompilerParams(
            dimension_semantics=("parallel", "parallel", "arbitrary"),
            vmem_limit_bytes=_vmem_budget_bytes()),
    )(x, weight)
    return out_flat.reshape(B, S, D)


# ---------------------------------------------------------------------------
# Module-equivalent forward
# ---------------------------------------------------------------------------
def embedding_forward(mask, weight, **kwargs):
    if mask.ndim == 2:
        assert jnp.issubdtype(mask.dtype, jnp.integer)
        return embedding_lookup(mask, weight, **kwargs)
    assert mask.ndim == 3 and jnp.issubdtype(mask.dtype, jnp.floating)
    return soft_embedding_matmul(mask, weight, **kwargs)


if __name__ == "__main__":
    key = jax.random.PRNGKey(0)
    keys = jax.random.split(key, 8)

    # --- Lookup, resident-table path (small shapes) ---
    V, D, B, S = 256, 128, 2, 8
    weight = jax.random.normal(keys[0], (V, D), dtype=jnp.float32)
    ids = jax.random.randint(keys[1], (B, S), 0, V, dtype=jnp.int32)
    out = jax.block_until_ready(embedding_forward(ids, weight))
    assert out.shape == (B, S, D)
    assert jnp.array_equal(out, weight[ids])          # gather is exact

    # --- Lookup, resident path, multi-block grid + row padding ---
    V2 = 1000
    weight2 = jax.random.normal(keys[2], (V2, D), dtype=jnp.float32)
    ids2 = jax.random.randint(keys[3], (4, 100), 0, V2, dtype=jnp.int32)
    out2 = jax.block_until_ready(
        embedding_lookup(ids2, weight2, rows_per_block=128))
    assert out2.shape == (4, 100, D)
    assert jnp.array_equal(out2, weight2[ids2])

    # --- Lookup, forced DMA-gather path (what VMEM-exceeding tables use) ---
    V3, D3 = 512, 256
    weight3 = jax.random.normal(keys[4], (V3, D3), dtype=jnp.float32)
    ids3 = jax.random.randint(keys[5], (3, 50), 0, V3, dtype=jnp.int32)
    out3 = jax.block_until_ready(
        embedding_lookup(ids3, weight3, rows_per_block=64, gather_mode="dma"))
    assert out3.shape == (3, 50, D3)
    assert jnp.array_equal(out3, weight3[ids3])

    # --- Soft mask, single K tile (V < 32100) ---
    soft = jax.random.uniform(keys[6], (B, S, V), dtype=jnp.float32)
    out_mm = jax.block_until_ready(embedding_forward(soft, weight))
    ref_mm = jnp.matmul(soft[:, :, :VOCAB_CLIP], weight[:VOCAB_CLIP, :])
    assert out_mm.shape == (B, S, D)
    assert jnp.allclose(out_mm, ref_mm, atol=1e-4, rtol=1e-4)

    # --- Soft mask, vocab beyond the 32100 clip (ragged last K tile) ---
    V4 = 32128
    weight4 = jax.random.normal(keys[7], (V4, D), dtype=jnp.float32)
    soft4 = jax.random.uniform(keys[6], (B, S, V4), dtype=jnp.float32)
    out_mm4 = jax.block_until_ready(embedding_forward(soft4, weight4))
    ref_mm4 = jnp.matmul(soft4[:, :, :VOCAB_CLIP], weight4[:VOCAB_CLIP, :])
    assert out_mm4.shape == (B, S, D)
    # Only accumulation-order / MXU-precision differences expected.
    assert jnp.allclose(out_mm4, ref_mm4, rtol=2e-2, atol=1.0)

    # --- Soft mask, opt-in bf16 MXU path (numerics intentionally looser) ---
    out_bf16 = jax.block_until_ready(
        soft_embedding_matmul(soft, weight, use_bf16=True))
    assert jnp.allclose(out_bf16, ref_mm, rtol=2e-2, atol=0.5)

    print("KERNEL_OK")
</pallas_src>

<mosaic_0001>
module attributes {stable_mosaic.version = 11 : i64} {
  func.func @_gather_resident_kernel(%arg0: i32, %arg1: memref<16xi32, #tpu.memory_space<smem>>, %arg2: memref<256x128xf32, #tpu.memory_space<any>>, %arg3: memref<16x128xf32, #tpu.memory_space<vmem>>, %arg4: memref<256x128xf32, #tpu.memory_space<vmem>>) attributes {dimension_semantics = [#tpu.dimension_semantics<arbitrary>], iteration_bounds = array<i64: 1>, scalar_prefetch = 1 : i64, scratch_operands = 1 : i64, tpu.core_type = #tpu.core_type<tc>, window_params = [{}, {transform_indices = @transform_1, window_bounds = array<i64: 16, 128>}]} {
    %c0_i32 = arith.constant 0 : i32
    %0 = arith.cmpi eq, %arg0, %c0_i32 : i32
    %1 = arith.extui %0 : i1 to i32
    %c0_i32_0 = arith.constant 0 : i32
    %2 = arith.cmpi ne, %1, %c0_i32_0 : i32
    scf.if %2 {
      "tpu.region"() ({
        %142 = tpu.sem_alloc : memref<!tpu.dma_semaphore, #tpu.memory_space<semaphore_mem>>
        tpu.enqueue_dma source(%arg2 : memref<256x128xf32, #tpu.memory_space<any>>) target(%arg4 : memref<256x128xf32, #tpu.memory_space<vmem>>) target_semaphore(%142 : memref<!tpu.dma_semaphore, #tpu.memory_space<semaphore_mem>>)
        tpu.wait_dma2 semaphore(%142 : memref<!tpu.dma_semaphore, #tpu.memory_space<semaphore_mem>>) src(%arg2 : memref<256x128xf32, #tpu.memory_space<any>>) dst(%arg4 : memref<256x128xf32, #tpu.memory_space<vmem>>)
        tpu.yield
      }) : () -> ()
    } else {
    }
    %c16_i32 = arith.constant 16 : i32
    %3 = arith.muli %arg0, %c16_i32 : i32
    %c0_i32_1 = arith.constant 0 : i32
    %c8_i32 = arith.constant 8 : i32
    %4 = arith.muli %c0_i32_1, %c8_i32 : i32
    %5 = tpu.assume_multiple %4, 8 : i32
    %6 = arith.addi %3, %5 : i32
    %c0_i32_2 = arith.constant 0 : i32
    %7 = arith.addi %6, %c0_i32_2 : i32
    %8 = arith.index_cast %7 : i32 to index
    %9 = memref.load %arg1[%8] : memref<16xi32, #tpu.memory_space<smem>>
    %c0_i32_3 = arith.constant 0 : i32
    %c255_i32 = arith.constant 255 : i32
    %10 = arith.maxsi %c0_i32_3, %9 : i32
    %11 = arith.minsi %c255_i32, %10 : i32
    %12 = arith.index_cast %11 : i32 to index
    %c0 = arith.constant 0 : index
    %13 = vector.load %arg4[%12, %c0] : memref<256x128xf32, #tpu.memory_space<vmem>>, vector<1x128xf32>
    %14 = arith.addi %3, %5 : i32
    %c1_i32 = arith.constant 1 : i32
    %15 = arith.addi %14, %c1_i32 : i32
    %16 = arith.index_cast %15 : i32 to index
    %17 = memref.load %arg1[%16] : memref<16xi32, #tpu.memory_space<smem>>
    %c0_i32_4 = arith.constant 0 : i32
    %c255_i32_5 = arith.constant 255 : i32
    %18 = arith.maxsi %c0_i32_4, %17 : i32
    %19 = arith.minsi %c255_i32_5, %18 : i32
    %20 = arith.index_cast %19 : i32 to index
    %c0_6 = arith.constant 0 : index
    %21 = vector.load %arg4[%20, %c0_6] : memref<256x128xf32, #tpu.memory_space<vmem>>, vector<1x128xf32>
    %22 = arith.addi %3, %5 : i32
    %c2_i32 = arith.constant 2 : i32
    %23 = arith.addi %22, %c2_i32 : i32
    %24 = arith.index_cast %23 : i32 to index
    %25 = memref.load %arg1[%24] : memref<16xi32, #tpu.memory_space<smem>>
    %c0_i32_7 = arith.constant 0 : i32
    %c255_i32_8 = arith.constant 255 : i32
    %26 = arith.maxsi %c0_i32_7, %25 : i32
    %27 = arith.minsi %c255_i32_8, %26 : i32
    %28 = arith.index_cast %27 : i32 to index
    %c0_9 = arith.constant 0 : index
    %29 = vector.load %arg4[%28, %c0_9] : memref<256x128xf32, #tpu.memory_space<vmem>>, vector<1x128xf32>
    %30 = arith.addi %3, %5 : i32
    %c3_i32 = arith.constant 3 : i32
    %31 = arith.addi %30, %c3_i32 : i32
    %32 = arith.index_cast %31 : i32 to index
    %33 = memref.load %arg1[%32] : memref<16xi32, #tpu.memory_space<smem>>
    %c0_i32_10 = arith.constant 0 : i32
    %c255_i32_11 = arith.constant 255 : i32
    %34 = arith.maxsi %c0_i32_10, %33 : i32
    %35 = arith.minsi %c255_i32_11, %34 : i32
    %36 = arith.index_cast %35 : i32 to index
    %c0_12 = arith.constant 0 : index
    %37 = vector.load %arg4[%36, %c0_12] : memref<256x128xf32, #tpu.memory_space<vmem>>, vector<1x128xf32>
    %38 = arith.addi %3, %5 : i32
    %c4_i32 = arith.constant 4 : i32
    %39 = arith.addi %38, %c4_i32 : i32
    %40 = arith.index_cast %39 : i32 to index
    %41 = memref.load %arg1[%40] : memref<16xi32, #tpu.memory_space<smem>>
    %c0_i32_13 = arith.constant 0 : i32
    %c255_i32_14 = arith.constant 255 : i32
    %42 = arith.maxsi %c0_i32_13, %41 : i32
    %43 = arith.minsi %c255_i32_14, %42 : i32
    %44 = arith.index_cast %43 : i32 to index
    %c0_15 = arith.constant 0 : index
    %45 = vector.load %arg4[%44, %c0_15] : memref<256x128xf32, #tpu.memory_space<vmem>>, vector<1x128xf32>
    %46 = arith.addi %3, %5 : i32
    %c5_i32 = arith.constant 5 : i32
    %47 = arith.addi %46, %c5_i32 : i32
    %48 = arith.index_cast %47 : i32 to index
    %49 = memref.load %arg1[%48] : memref<16xi32, #tpu.memory_space<smem>>
    %c0_i32_16 = arith.constant 0 : i32
    %c255_i32_17 = arith.constant 255 : i32
    %50 = arith.maxsi %c0_i32_16, %49 : i32
    %51 = arith.minsi %c255_i32_17, %50 : i32
    %52 = arith.index_cast %51 : i32 to index
    %c0_18 = arith.constant 0 : index
    %53 = vector.load %arg4[%52, %c0_18] : memref<256x128xf32, #tpu.memory_space<vmem>>, vector<1x128xf32>
    %54 = arith.addi %3, %5 : i32
    %c6_i32 = arith.constant 6 : i32
    %55 = arith.addi %54, %c6_i32 : i32
    %56 = arith.index_cast %55 : i32 to index
    %57 = memref.load %arg1[%56] : memref<16xi32, #tpu.memory_space<smem>>
    %c0_i32_19 = arith.constant 0 : i32
    %c255_i32_20 = arith.constant 255 : i32
    %58 = arith.maxsi %c0_i32_19, %57 : i32
    %59 = arith.minsi %c255_i32_20, %58 : i32
    %60 = arith.index_cast %59 : i32 to index
    %c0_21 = arith.constant 0 : index
    %61 = vector.load %arg4[%60, %c0_21] : memref<256x128xf32, #tpu.memory_space<vmem>>, vector<1x128xf32>
    %62 = arith.addi %3, %5 : i32
    %c7_i32 = arith.constant 7 : i32
    %63 = arith.addi %62, %c7_i32 : i32
    %64 = arith.index_cast %63 : i32 to index
    %65 = memref.load %arg1[%64] : memref<16xi32, #tpu.memory_space<smem>>
    %c0_i32_22 = arith.constant 0 : i32
    %c255_i32_23 = arith.constant 255 : i32
    %66 = arith.maxsi %c0_i32_22, %65 : i32
    %67 = arith.minsi %c255_i32_23, %66 : i32
    %68 = arith.index_cast %67 : i32 to index
    %c0_24 = arith.constant 0 : index
    %69 = vector.load %arg4[%68, %c0_24] : memref<256x128xf32, #tpu.memory_space<vmem>>, vector<1x128xf32>
    %70 = tpu.concatenate %13, %21, %29, %37, %45, %53, %61, %69 in 0 : vector<1x128xf32>, vector<1x128xf32>, vector<1x128xf32>, vector<1x128xf32>, vector<1x128xf32>, vector<1x128xf32>, vector<1x128xf32>, vector<1x128xf32> -> vector<8x128xf32>
    %71 = arith.index_cast %5 : i32 to index
    %c0_25 = arith.constant 0 : index
    %72 = vector.load %arg3[%71, %c0_25] : memref<16x128xf32, #tpu.memory_space<vmem>>, vector<8x128xf32>
    tpu.vector_store %arg3[%71, %c0_25], %70 {strides = array<i32>} : memref<16x128xf32, #tpu.memory_space<vmem>>, vector<8x128xf32>,
    %c1_i32_26 = arith.constant 1 : i32
    %c8_i32_27 = arith.constant 8 : i32
    %73 = arith.muli %c1_i32_26, %c8_i32_27 : i32
    %74 = tpu.assume_multiple %73, 8 : i32
    %75 = arith.addi %3, %74 : i32
    %c0_i32_28 = arith.constant 0 : i32
    %76 = arith.addi %75, %c0_i32_28 : i32
    %77 = arith.index_cast %76 : i32 to index
    %78 = memref.load %arg1[%77] : memref<16xi32, #tpu.memory_space<smem>>
    %c0_i32_29 = arith.constant 0 : i32
    %c255_i32_30 = arith.constant 255 : i32
    %79 = arith.maxsi %c0_i32_29, %78 : i32
    %80 = arith.minsi %c255_i32_30, %79 : i32
    %81 = arith.index_cast %80 : i32 to index
    %c0_31 = arith.constant 0 : index
    %82 = vector.load %arg4[%81, %c0_31] : memref<256x128xf32, #tpu.memory_space<vmem>>, vector<1x128xf32>
    %83 = arith.addi %3, %74 : i32
    %c1_i32_32 = arith.constant 1 : i32
    %84 = arith.addi %83, %c1_i32_32 : i32
    %85 = arith.index_cast %84 : i32 to index
    %86 = memref.load %arg1[%85] : memref<16xi32, #tpu.memory_space<smem>>
    %c0_i32_33 = arith.constant 0 : i32
    %c255_i32_34 = arith.constant 255 : i32
    %87 = arith.maxsi %c0_i32_33, %86 : i32
    %88 = arith.minsi %c255_i32_34, %87 : i32
    %89 = arith.index_cast %88 : i32 to index
    %c0_35 = arith.constant 0 : index
    %90 = vector.load %arg4[%89, %c0_35] : memref<256x128xf32, #tpu.memory_space<vmem>>, vector<1x128xf32>
    %91 = arith.addi %3, %74 : i32
    %c2_i32_36 = arith.constant 2 : i32
    %92 = arith.addi %91, %c2_i32_36 : i32
    %93 = arith.index_cast %92 : i32 to index
    %94 = memref.load %arg1[%93] : memref<16xi32, #tpu.memory_space<smem>>
    %c0_i32_37 = arith.constant 0 : i32
    %c255_i32_38 = arith.constant 255 : i32
    %95 = arith.maxsi %c0_i32_37, %94 : i32
    %96 = arith.minsi %c255_i32_38, %95 : i32
    %97 = arith.index_cast %96 : i32 to index
    %c0_39 = arith.constant 0 : index
    %98 = vector.load %arg4[%97, %c0_39] : memref<256x128xf32, #tpu.memory_space<vmem>>, vector<1x128xf32>
    %99 = arith.addi %3, %74 : i32
    %c3_i32_40 = arith.constant 3 : i32
    %100 = arith.addi %99, %c3_i32_40 : i32
    %101 = arith.index_cast %100 : i32 to index
    %102 = memref.load %arg1[%101] : memref<16xi32, #tpu.memory_space<smem>>
    %c0_i32_41 = arith.constant 0 : i32
    %c255_i32_42 = arith.constant 255 : i32
    %103 = arith.maxsi %c0_i32_41, %102 : i32
    %104 = arith.minsi %c255_i32_42, %103 : i32
    %105 = arith.index_cast %104 : i32 to index
    %c0_43 = arith.constant 0 : index
    %106 = vector.load %arg4[%105, %c0_43] : memref<256x128xf32, #tpu.memory_space<vmem>>, vector<1x128xf32>
    %107 = arith.addi %3, %74 : i32
    %c4_i32_44 = arith.constant 4 : i32
    %108 = arith.addi %107, %c4_i32_44 : i32
    %109 = arith.index_cast %108 : i32 to index
    %110 = memref.load %arg1[%109] : memref<16xi32, #tpu.memory_space<smem>>
    %c0_i32_45 = arith.constant 0 : i32
    %c255_i32_46 = arith.constant 255 : i32
    %111 = arith.maxsi %c0_i32_45, %110 : i32
    %112 = arith.minsi %c255_i32_46, %111 : i32
    %113 = arith.index_cast %112 : i32 to index
    %c0_47 = arith.constant 0 : index
    %114 = vector.load %arg4[%113, %c0_47] : memref<256x128xf32, #tpu.memory_space<vmem>>, vector<1x128xf32>
    %115 = arith.addi %3, %74 : i32
    %c5_i32_48 = arith.constant 5 : i32
    %116 = arith.addi %115, %c5_i32_48 : i32
    %117 = arith.index_cast %116 : i32 to index
    %118 = memref.load %arg1[%117] : memref<16xi32, #tpu.memory_space<smem>>
    %c0_i32_49 = arith.constant 0 : i32
    %c255_i32_50 = arith.constant 255 : i32
    %119 = arith.maxsi %c0_i32_49, %118 : i32
    %120 = arith.minsi %c255_i32_50, %119 : i32
    %121 = arith.index_cast %120 : i32 to index
    %c0_51 = arith.constant 0 : index
    %122 = vector.load %arg4[%121, %c0_51] : memref<256x128xf32, #tpu.memory_space<vmem>>, vector<1x128xf32>
    %123 = arith.addi %3, %74 : i32
    %c6_i32_52 = arith.constant 6 : i32
    %124 = arith.addi %123, %c6_i32_52 : i32
    %125 = arith.index_cast %124 : i32 to index
    %126 = memref.load %arg1[%125] : memref<16xi32, #tpu.memory_space<smem>>
    %c0_i32_53 = arith.constant 0 : i32
    %c255_i32_54 = arith.constant 255 : i32
    %127 = arith.maxsi %c0_i32_53, %126 : i32
    %128 = arith.minsi %c255_i32_54, %127 : i32
    %129 = arith.index_cast %128 : i32 to index
    %c0_55 = arith.constant 0 : index
    %130 = vector.load %arg4[%129, %c0_55] : memref<256x128xf32, #tpu.memory_space<vmem>>, vector<1x128xf32>
    %131 = arith.addi %3, %74 : i32
    %c7_i32_56 = arith.constant 7 : i32
    %132 = arith.addi %131, %c7_i32_56 : i32
    %133 = arith.index_cast %132 : i32 to index
    %134 = memref.load %arg1[%133] : memref<16xi32, #tpu.memory_space<smem>>
    %c0_i32_57 = arith.constant 0 : i32
    %c255_i32_58 = arith.constant 255 : i32
    %135 = arith.maxsi %c0_i32_57, %134 : i32
    %136 = arith.minsi %c255_i32_58, %135 : i32
    %137 = arith.index_cast %136 : i32 to index
    %c0_59 = arith.constant 0 : index
    %138 = vector.load %arg4[%137, %c0_59] : memref<256x128xf32, #tpu.memory_space<vmem>>, vector<1x128xf32>
    %139 = tpu.concatenate %82, %90, %98, %106, %114, %122, %130, %138 in 0 : vector<1x128xf32>, vector<1x128xf32>, vector<1x128xf32>, vector<1x128xf32>, vector<1x128xf32>, vector<1x128xf32>, vector<1x128xf32>, vector<1x128xf32> -> vector<8x128xf32>
    %140 = arith.index_cast %74 : i32 to index
    %c0_60 = arith.constant 0 : index
    %141 = vector.load %arg3[%140, %c0_60] : memref<16x128xf32, #tpu.memory_space<vmem>>, vector<8x128xf32>
    tpu.vector_store %arg3[%140, %c0_60], %139 {strides = array<i32>} : memref<16x128xf32, #tpu.memory_space<vmem>>, vector<8x128xf32>,
    %c2_i32_61 = arith.constant 2 : i32
    return
  }
  func.func @transform_1(%arg0: i32, %arg1: memref<16xi32, #tpu.memory_space<smem>>) -> (i32, i32) {
    %c0_i32 = arith.constant 0 : i32
    %c0_i32_0 = arith.constant 0 : i32
    return %arg0, %c0_i32 : i32, i32
  }
}

</mosaic_0001>

<bundles_post_ra>
// kernel: tpu_custom_call.1
= control target key start
LH: loop header
LB: loop body
LE: loop exit
PB: predicated region body
PF: predicated region fallthrough
CT: control target
= control target key end

     0   :  { %s569_s0 = inlined_call_operand.hbm [shape: s32[16], index: 0, kind: input, shape index: {}]   ;;  %s570_s1 = inlined_call_operand.hbm [shape: f32[256,128], index: 1, kind: input, shape index: {}]   ;;  %s571_s2 = inlined_call_operand.hbm [shape: f32[16,128], index: 2, kind: output, shape index: {}]  }
   0x1   :  { %s389_s11 = scalar_lea.hbm %s569_s0, 16 }
   0x2   :  { %p390_p0 = scmp.ne.s32.totalorder %s569_s0, %s389_s11  ;;  %p393_p1 = scmp.lt.u32.totalorder %s389_s11, %s569_s0 }
   0x4   :  { %p395_p2 = pnand %p393_p1, %p390_p0 }
   0x6   :  { %398 = shalt.err (!%p395_p2)  }
   0x7   :  { %s449_s16 = smov [#allocation4]  }
   0x8   :  { %8 = dma.hbm_to_smem %s569_s0, 16, %s449_s16, [#allocation3] }
   0x9   :  { %443 = dma.done.wait [#allocation3], 16 }
   0xa   :  { %444 = vsyncadd [#allocation3], 4294967280 }
   0xb   :  { %10 = sfence }
   0xc   :  { %11 = vsyncpa [#allocation6], 0 }
   0xd   :  { %s450_s19 = smov [#allocation2]   ;;  %s399_s23 = scalar_lea.hbm %s570_s1, 4096 }
   0xe   :  { %s23_s20 = sshll.u32 %s450_s19, 4  ;;  %p400_p3 = scmp.ne.s32.totalorder %s570_s1, %s399_s23  ;;  %s24_s20 = int_to_ptr.vmem [resolvable:$true] %s23_s20 }
   0xf   :  { %p403_p4 = scmp.lt.u32.totalorder %s399_s23, %s570_s1 }
  0x11   :  { %p405_p5 = pnand %p403_p4, %p400_p3 }
  0x13   :  { %408 = shalt.err (!%p405_p5)  }
  0x14   :  { %s409_s0 = scalar_lea.vmem %s24_s20, 4096  ;;  %p414_p7 = scmp.lt.s32.totalorder %s24_s20, %s24_s20 }
  0x15   :  { %p410_p6 = scmp.ne.s32.totalorder %s24_s20, %s409_s0  ;;  %p415_p8 = scmp.lt.s32.totalorder %s409_s0, %s409_s0 }
  0x17   :  { %p416_p9 = por %p415_p8, %p414_p7 }
  0x19   :  { %p417_p10 = pnand %p416_p9, %p410_p6 }
  0x1b   :  { %420 = shalt.err (!%p417_p10)  }
  0x1c   :  { %26 = dma.hbm_to_vmem [thread:$0]  %s570_s1, 4096, %s24_s20, [#allocation7] }
  0x1d   :  { %445 = dma.done.wait [#allocation7], 4096 }
  0x1e   :  { %446 = vsyncadd [#allocation7], 4294963200  ;;  %s32_s30 = sld [smem:[#allocation4]]  ;;  %s262_s3 = sld [smem:[#allocation4 + $0x1]]  ;;  %vm116_vm0 = vcmask 1040384   ;;  %vm118_vm1 = vcmask 1041408  }
  0x1f   :  { %s268_s4 = sld [smem:[#allocation4 + $0x2]]  ;;  %s493_s5 = sld [smem:[#allocation4 + $0x3]]  ;;  %vm120_vm2 = vcmask 1042432   ;;  %vm122_vm3 = vcmask 1043456   ;;  %vm124_vm4 = vcmask 1044480   ;;  %vm126_vm5 = vcmask 1045504  }
  0x20   :  { %s495_s6 = sld [smem:[#allocation4 + $0x4]]  ;;  %s497_s7 = sld [smem:[#allocation4 + $0x5]]  ;;  %vm128_vm6 = vcmask 1046528  }
  0x21   :  { %s499_s8 = sld [smem:[#allocation4 + $0x6]]  ;;  %s501_s9 = sld [smem:[#allocation4 + $0x7]] }
  0x22   :  { %s503_s10 = sld [smem:[#allocation4 + $0x8]]  ;;  %s505_s11 = sld [smem:[#allocation4 + $0x9]] }
  0x23   :  { %s507_s1 = sld [smem:[#allocation4 + $0xa]]  ;;  %s509_s12 = sld [smem:[#allocation4 + $0xb]] }
  0x24   :  { %p33_p11 = scmp.gt.s32.totalorder %s32_s30, 0  ;;  %p257_p12 = scmp.lt.s32.totalorder %s32_s30, 255 }
  0x25   :  { %p41_p13 = scmp.gt.s32.totalorder %s262_s3, 0  ;;  %p263_p0 = scmp.lt.s32.totalorder %s262_s3, 255 }
  0x26   :  { %s573_s30 = smov (!%p33_p11, %s32_s30), 0  ;;  %p49_p1 = scmp.gt.s32.totalorder %s268_s4, 0 }
  0x27   :  { %s575_s3 = smov (!%p41_p13, %s262_s3), 0  ;;  %s577_s30 = smov (!%p257_p12, %s573_s30), 255 }
  0x28   :  { %s579_s3 = smov (!%p263_p0, %s575_s3), 255  ;;  %p269_p2 = scmp.lt.s32.totalorder %s268_s4, 255 }
  0x29   :  { %s45_s13 = scalar_lea.vmem [#allocation2], %s579_s3  ;;  %s581_s4 = smov (!%p49_p1, %s268_s4), 0 }
  0x2a   :  { %v46_v0 = vld [vmem:[%s45_s13] sm:$0x1]  ;;  %p57_p3 = scmp.gt.s32.totalorder %s493_s5, 0  ;;  %p275_p4 = scmp.lt.s32.totalorder %s493_s5, 255 }
  0x2b   :  { %s583_s4 = smov (!%p269_p2, %s581_s4), 255  ;;  %v96_v1 = vrot.slane %v46_v0, 7  ;;  %s37_s14 = scalar_lea.vmem [#allocation2], %s577_s30 }
  0x2c   :  { %s585_s5 = smov (!%p57_p3, %s493_s5), 0  ;;  %v38_v2 = vld [vmem:[%s37_s14] sm:$0x1]  ;;  %p65_p5 = scmp.gt.s32.totalorder %s495_s6, 0 }
  0x2d   :  { %s53_s15 = scalar_lea.vmem [#allocation2], %s583_s4  ;;  %s587_s5 = smov (!%p275_p4, %s585_s5), 255  ;;  %v117_v5 = vsel %vm116_vm0, %v38_v2, %v96_v1 }
  0x2e   :  { %v54_v3 = vld [vmem:[%s53_s15] sm:$0x1]  ;;  %s66_s16 = scalar_select %p65_p5, %s495_s6, 0 }
  0x2f   :  { %v99_v4 = vrot.slane %v54_v3, 6  ;;  %p281_p6 = scmp.lt.s32.totalorder %s495_s6, 255  ;;  %s61_s17 = scalar_lea.vmem [#allocation2], %s587_s5 }
  0x30   :  { %v62_v6 = vld [vmem:[%s61_s17] sm:$0x1]  ;;  %p73_p7 = scmp.gt.s32.totalorder %s497_s7, 0  ;;  %p287_p8 = scmp.lt.s32.totalorder %s497_s7, 255 }
  0x31   :  { %s589_s16 = smov (!%p281_p6, %s66_s16), 255  ;;  %v102_v7 = vrot.slane %v62_v6, 5  ;;  %v119_v8 = vsel %vm118_vm1, %v117_v5, %v99_v4  ;;  %p81_p9 = scmp.gt.s32.totalorder %s499_s8, 0 }
  0x32   :  { %s591_s7 = smov (!%p73_p7, %s497_s7), 0  ;;  %s69_s18 = scalar_lea.vmem [#allocation2], %s589_s16 }
  0x33   :  { %v70_v9 = vld [vmem:[%s69_s18] sm:$0x1]  ;;  %s593_s7 = smov (!%p287_p8, %s591_s7), 255  ;;  %v121_v11 = vsel %vm120_vm2, %v119_v8, %v102_v7  ;;  %p293_p10 = scmp.lt.s32.totalorder %s499_s8, 255 }
  0x34   :  { %s82_s19 = scalar_select %p81_p9, %s499_s8, 0  ;;  %v105_v10 = vrot.slane %v70_v9, 4 }
  0x35   :  { %s77_s20 = scalar_lea.vmem [#allocation2], %s593_s7  ;;  %p89_p11 = scmp.gt.s32.totalorder %s501_s9, 0 }
  0x36   :  { %v78_v12 = vld [vmem:[%s77_s20] sm:$0x1]  ;;  %p299_p12 = scmp.lt.s32.totalorder %s501_s9, 255  ;;  %s595_s19 = smov (!%p293_p10, %s82_s19), 255  ;;  %v123_v14 = vsel %vm122_vm3, %v121_v11, %v105_v10 }
  0x37   :  { %v108_v13 = vrot.slane %v78_v12, 3  ;;  %s597_s9 = smov (!%p89_p11, %s501_s9), 0  ;;  %p133_p13 = scmp.gt.s32.totalorder %s503_s10, 0 }
  0x38   :  { %s85_s21 = scalar_lea.vmem [#allocation2], %s595_s19  ;;  %s599_s9 = smov (!%p299_p12, %s597_s9), 255 }
  0x39   :  { %v86_v15 = vld [vmem:[%s85_s21] sm:$0x1]  ;;  %v125_v16 = vsel %vm124_vm4, %v123_v14, %v108_v13  ;;  %s134_s22 = scalar_select %p133_p13, %s503_s10, 0 }
  0x3a   :  { %v111_v17 = vrot.slane %v86_v15, 2  ;;  %p305_p0 = scmp.lt.s32.totalorder %s503_s10, 255  ;;  %s93_s23 = scalar_lea.vmem [#allocation2], %s599_s9 }
  0x3b   :  { %v94_v18 = vld [vmem:[%s93_s23] sm:$0x1]  ;;  %p141_p1 = scmp.gt.s32.totalorder %s505_s11, 0  ;;  %p311_p2 = scmp.lt.s32.totalorder %s505_s11, 255 }
  0x3c   :  { %v127_v19 = vsel %vm126_vm5, %v125_v16, %v111_v17  ;;  %v114_v20 = vrot.slane %v94_v18, 1  ;;  %s601_s22 = smov (!%p305_p0, %s134_s22), 255  ;;  %p149_p3 = scmp.gt.s32.totalorder %s507_s1, 0 }
  0x3d   :  { %s603_s11 = smov (!%p141_p1, %s505_s11), 0  ;;  %p317_p4 = scmp.lt.s32.totalorder %s507_s1, 255 }
  0x3e   :  { %v129_v21 = vsel %vm128_vm6, %v127_v19, %v114_v20  ;;  %s605_s11 = smov (!%p311_p2, %s603_s11), 255  ;;  %p157_p5 = scmp.gt.s32.totalorder %s509_s12, 0 }
  0x3f   :  { %130 = vst [vmem:[#allocation5] sm:$0xff] %v129_v21  ;;  %s150_s24 = scalar_select %p149_p3, %s507_s1, 0 }
  0x40   :  { %p323_p6 = scmp.lt.s32.totalorder %s509_s12, 255  ;;  %s609_s12 = smov (!%p157_p5, %s509_s12), 0 }
  0x41   :  { %s607_s24 = smov (!%p317_p4, %s150_s24), 255  ;;  %s328_s25 = sld [smem:[#allocation4 + $0xc]] }
  0x42   :  { %s145_s26 = scalar_lea.vmem [#allocation2], %s605_s11  ;;  %s611_s12 = smov (!%p323_p6, %s609_s12), 255 }
  0x43   :  { %v146_v22 = vld [vmem:[%s145_s26] sm:$0x1]  ;;  %s334_s27 = sld [smem:[#allocation4 + $0xd]]  ;;  %s153_s0 = scalar_lea.vmem [#allocation2], %s607_s24 }
  0x44   :  { %v154_v23 = vld [vmem:[%s153_s0] sm:$0x1]  ;;  %s545_s28 = sld [smem:[#allocation4 + $0xe]]  ;;  %v196_v24 = vrot.slane %v146_v22, 7  ;;  %s137_s29 = scalar_lea.vmem [#allocation2], %s601_s22 }
  0x45   :  { %v138_v25 = vld [vmem:[%s137_s29] sm:$0x1]  ;;  %s161_s30 = scalar_lea.vmem [#allocation2], %s611_s12  ;;  %s346_s3 = sld [smem:[#allocation4 + $0xf]]  ;;  %v199_v27 = vrot.slane %v154_v23, 6 }
  0x46   :  { %v162_v26 = vld [vmem:[%s161_s30] sm:$0x1]  ;;  %v216_v28 = vsel %vm116_vm0, %v138_v25, %v196_v24  ;;  %s451_s8 = smov [#allocation5]  }
  0x47   :  { %p165_p7 = scmp.gt.s32.totalorder %s328_s25, 0  ;;  %p329_p8 = scmp.lt.s32.totalorder %s328_s25, 255  ;;  %v202_v29 = vrot.slane %v162_v26, 5  ;;  %v217_v30 = vsel %vm118_vm1, %v216_v28, %v199_v27 }
  0x48   :  { %s230_s9 = sshll.u32 %s451_s8, 4  ;;  %s231_s9 = int_to_ptr.vmem [resolvable:$true] %s230_s9 }
  0x49   :  { %s613_s25 = smov (!%p165_p7, %s328_s25), 0  ;;  %p173_p9 = scmp.gt.s32.totalorder %s334_s27, 0  ;;  %v218_v33 = vsel %vm120_vm2, %v217_v30, %v202_v29 }
  0x4a   :  { %p335_p10 = scmp.lt.s32.totalorder %s334_s27, 255  ;;  %s615_s25 = smov (!%p329_p8, %s613_s25), 255 }
  0x4b   :  { %s617_s27 = smov (!%p173_p9, %s334_s27), 0  ;;  %p181_p11 = scmp.gt.s32.totalorder %s545_s28, 0 }
  0x4c   :  { %s169_s4 = scalar_lea.vmem [#allocation2], %s615_s25  ;;  %s619_s27 = smov (!%p335_p10, %s617_s27), 255 }
  0x4d   :  { %v170_v31 = vld [vmem:[%s169_s4] sm:$0x1]  ;;  %s182_s5 = scalar_select %p181_p11, %s545_s28, 0 }
  0x4e   :  { %v205_v32 = vrot.slane %v170_v31, 4  ;;  %p341_p12 = scmp.lt.s32.totalorder %s545_s28, 255  ;;  %s177_s6 = scalar_lea.vmem [#allocation2], %s619_s27 }
  0x4f   :  { %v178_v34 = vld [vmem:[%s177_s6] sm:$0x1]  ;;  %p189_p13 = scmp.gt.s32.totalorder %s346_s3, 0  ;;  %p347_p0 = scmp.lt.s32.totalorder %s346_s3, 255 }
  0x50   :  { %s621_s5 = smov (!%p341_p12, %s182_s5), 255  ;;  %v208_v35 = vrot.slane %v178_v34, 3  ;;  %v219_v36 = vsel %vm122_vm3, %v218_v33, %v205_v32  ;;  %s421_s11 = scalar_lea.vmem %s231_s9, 256 }
  0x51   :  { %s623_s3 = smov (!%p189_p13, %s346_s3), 0  ;;  %s185_s7 = scalar_lea.vmem [#allocation2], %s621_s5 }
  0x52   :  { %v186_v37 = vld [vmem:[%s185_s7] sm:$0x1]  ;;  %s625_s3 = smov (!%p347_p0, %s623_s3), 255  ;;  %v220_v38 = vsel %vm124_vm4, %v219_v36, %v208_v35  ;;  %p422_p1 = scmp.ne.s32.totalorder %s231_s9, %s421_s11 }
  0x53   :  { %v211_v39 = vrot.slane %v186_v37, 2  ;;  %s193_s10 = scalar_lea.vmem [#allocation2], %s625_s3  ;;  %p426_p2 = scmp.lt.s32.totalorder %s231_s9, %s231_s9 }
  0x54   :  { %v194_v40 = vld [vmem:[%s193_s10] sm:$0x1]  ;;  %p427_p3 = scmp.lt.s32.totalorder %s421_s11, %s421_s11 }
  0x55   :  { %v221_v41 = vsel %vm126_vm5, %v220_v38, %v211_v39  ;;  %v214_v42 = vrot.slane %v194_v40, 1 }
  0x56   :  { %p428_p4 = por %p427_p3, %p426_p2 }
  0x57   :  { %v222_v43 = vsel %vm128_vm6, %v221_v41, %v214_v42 }
  0x58   :  { %224 = vst [vmem:[#allocation5 + $0x8] sm:$0xff] %v222_v43  ;;  %p429_p5 = pnand %p428_p4, %p422_p1 }
  0x5a   :  { %432 = shalt.err (!%p429_p5)
}
  0x5b   :  { %s433_s13 = scalar_lea.hbm %s571_s2, 256 }
  0x5c   :  { %p434_p6 = scmp.ne.s32.totalorder %s571_s2, %s433_s13  ;;  %p437_p7 = scmp.lt.u32.totalorder %s433_s13, %s571_s2 }
  0x5e   :  { %p439_p8 = pnand %p437_p7, %p434_p6 }
  0x60   :  { %442 = shalt.err (!%p439_p8)
}
  0x61   :  { %s452_s18 = smov 128   ;;  %s453_s19 = smov 8  }
  0x62   :  { %236 = dma.vmem_to_hbm [thread:$0]  %s231_s9, 256, %s571_s2, [#allocation6], %s452_s18, %s452_s18, %s453_s19  }
  0x63   :  { %447 = dma.done.wait [#allocation6], 256  }
  0x64   :  { %448 = vsyncadd [#allocation6], 4294967040 }
  0x65   :  { %240 = vsyncpa [#allocation6], 1 }

</bundles_post_ra>
